<compile_context>
chip_gen: v7x
topology: tpu7x:2x2x1
jax: 0.10.0
libtpu: 0.0.40
codegen_flags: <defaults>
</compile_context>

<pallas_src>
import functools

import jax
import jax.numpy as jnp
from jax import lax
from jax.experimental import pallas as pl
from jax.experimental.pallas import tpu as pltpu


def _lstm_fc_kernel(x_ref, wih_ref, whh_ref, b_ref, fcw_ref, fcb_ref,
                    o_ref, gx_sc, *, batch, hidden, seq_len, input_size):
    """Whole sequence in one invocation. Time-major 3D layout; hoisted input
    projection; serial recurrence with vreg-resident h/c carries; per-step FC head
    stored directly into the output tile for that step."""
    B, H, T, I = batch, hidden, seq_len, input_size

    w_hh = whh_ref[...]                                   # (H, 4H) stays resident
    fc_w = fcw_ref[...]                                   # (H, P)
    fc_b = fcb_ref[...]                                   # (1, P)
    bias = b_ref[...]                                     # (1, 4H)

    if I == 1:
        # Hoisted input projection for all T steps at once:
        #   gx[t, b, :] = x[t, b, 0] * W_ih[0, :] + bias   -- single VPU broadcast-mul,
        # avoids a K=1 MXU pass. Staged in VMEM, read back per step (tile-aligned).
        gx_sc[...] = x_ref[...] * wih_ref[...] + bias      # (T,B,1)*(1,4H) -> (T,B,4H)

    def step(t, carry):
        h, c = carry
        if I == 1:
            gates_x = gx_sc[t]                             # (B, 4H), leading-axis read
        else:
            gates_x = jnp.dot(x_ref[t], wih_ref[...],
                              preferred_element_type=jnp.float32) + bias
        gates = gates_x + jnp.dot(h, w_hh,
                                  preferred_element_type=jnp.float32)   # (B, 4H)
        # One full-width sigmoid; i, f, o come from its lane slices; tanh only on g.
        act = jax.nn.sigmoid(gates)
        i_g = act[:, 0 * H:1 * H]
        f_g = act[:, 1 * H:2 * H]
        o_g = act[:, 3 * H:4 * H]
        g_g = jnp.tanh(gates[:, 2 * H:3 * H])
        c_new = f_g * c + i_g * g_g
        h_new = o_g * jnp.tanh(c_new)
        # FC head on h_t: not on the h/c serial chain, so it overlaps with the next
        # step's recurrence matmul. Store straight into this step's output tile.
        o_ref[t] = jax.nn.sigmoid(
            jnp.dot(h_new, fc_w, preferred_element_type=jnp.float32) + fc_b
        ).astype(o_ref.dtype)
        return h_new, c_new

    h0 = jnp.zeros((B, H), jnp.float32)
    c0 = jnp.zeros((B, H), jnp.float32)
    lax.fori_loop(0, T, step, (h0, c0), unroll=bool(T <= 64))


@jax.jit
def lstm_forecasting_pallas(x, w_ih, w_hh, b, fc_w, fc_b):
    """x: (B, T, I) float32. Returns (B, T, P) float32."""
    B, T, I = x.shape
    H = w_hh.shape[0]
    P = fc_w.shape[1]

    # Time-major layout so every per-step access in the kernel is a leading-axis index.
    x_tm = jnp.transpose(x, (1, 0, 2))                     # (T, B, I)

    kernel = functools.partial(_lstm_fc_kernel,
                               batch=B, hidden=H, seq_len=T, input_size=I)
    vmem = lambda: pl.BlockSpec(memory_space=pltpu.MemorySpace.VMEM)

    out_tm = pl.pallas_call(
        kernel,
        out_shape=jax.ShapeDtypeStruct((T, B, P), jnp.float32),
        in_specs=[vmem() for _ in range(6)],
        out_specs=vmem(),
        scratch_shapes=[
            pltpu.VMEM((T, B, 4 * H), jnp.float32),        # staged input projection
        ],
    )(x_tm, w_ih, w_hh, b, fc_w, fc_b)

    return jnp.transpose(out_tm, (1, 0, 2))                # (B, T, P)


# ---------------- deterministic parameter init (mirrors module __init__) --------------

def init_params(key, input_size=1, hidden_size=32, num_params=10):
    k1, k2, k3, k4 = jax.random.split(key, 4)
    H, I, P = hidden_size, input_size, num_params

    # weight_ih_l0: Xavier uniform, shape (4H, I)
    bound_ih = (6.0 / (4 * H + I)) ** 0.5
    w_ih_pt = jax.random.uniform(k1, (4 * H, I), jnp.float32, -bound_ih, bound_ih)

    # weight_hh_l0: orthogonal, shape (4H, H) -> orthonormal columns via QR
    a = jax.random.normal(k2, (4 * H, H), jnp.float32)
    q, r = jnp.linalg.qr(a)
    q = q * jnp.sign(jnp.diagonal(r))[None, :]             # deterministic sign fix
    w_hh_pt = q                                            # (4H, H)

    # biases b_ih, b_hh: zeros
    b = jnp.zeros((1, 4 * H), jnp.float32)

    # fc: PyTorch Linear default init U(-1/sqrt(H), 1/sqrt(H))
    bound_fc = 1.0 / (H ** 0.5)
    fc_w_pt = jax.random.uniform(k3, (P, H), jnp.float32, -bound_fc, bound_fc)
    fc_b = jax.random.uniform(k4, (1, P), jnp.float32, -bound_fc, bound_fc)

    # kernel layouts (transposed for x @ W)
    return (jnp.transpose(w_ih_pt),    # (I, 4H)
            jnp.transpose(w_hh_pt),    # (H, 4H)
            b,
            jnp.transpose(fc_w_pt),    # (H, P)
            fc_b)


# ---------------- pure-JAX reference for correctness check ---------------------------

def reference_forward(x, w_ih, w_hh, b, fc_w, fc_b):
    B, T, I = x.shape
    H = w_hh.shape[0]

    def step(carry, xt):
        h, c = carry
        gates = xt @ w_ih + h @ w_hh + b
        i = jax.nn.sigmoid(gates[:, 0 * H:1 * H])
        f = jax.nn.sigmoid(gates[:, 1 * H:2 * H])
        g = jnp.tanh(gates[:, 2 * H:3 * H])
        o = jax.nn.sigmoid(gates[:, 3 * H:4 * H])
        c = f * c + i * g
        h = o * jnp.tanh(c)
        return (h, c), h

    h0 = jnp.zeros((B, H), jnp.float32)
    c0 = jnp.zeros((B, H), jnp.float32)
    _, hs = jax.lax.scan(step, (h0, c0), jnp.transpose(x, (1, 0, 2)))   # (T, B, H)
    out = jax.nn.sigmoid(hs @ fc_w + fc_b)                              # (T, B, P)
    return jnp.transpose(out, (1, 0, 2))


if __name__ == "__main__":
    B, T = 2, 8
    INPUT_SIZE, HIDDEN_SIZE, NUM_PARAMS = 1, 32, 10

    key = jax.random.PRNGKey(0)
    kx, kp = jax.random.split(key)

    x = jax.random.normal(kx, (B, T, INPUT_SIZE), jnp.float32)
    w_ih, w_hh, b, fc_w, fc_b = init_params(kp, INPUT_SIZE, HIDDEN_SIZE, NUM_PARAMS)

    out = lstm_forecasting_pallas(x, w_ih, w_hh, b, fc_w, fc_b)
    out = jax.block_until_ready(out)

    ref = reference_forward(x, w_ih, w_hh, b, fc_w, fc_b)
    assert out.shape == (B, T, NUM_PARAMS)
    assert jnp.allclose(out, ref, atol=1e-5, rtol=1e-5), "mismatch vs JAX reference"

    print("KERNEL_OK")
</pallas_src>

<mosaic_0001>
module attributes {stable_mosaic.version = 11 : i64} {
  func.func @_lstm_fc_kernel(%arg0: memref<8x2x1xf32, #tpu.memory_space<vmem>>, %arg1: memref<1x128xf32, #tpu.memory_space<vmem>>, %arg2: memref<32x128xf32, #tpu.memory_space<vmem>>, %arg3: memref<1x128xf32, #tpu.memory_space<vmem>>, %arg4: memref<32x10xf32, #tpu.memory_space<vmem>>, %arg5: memref<1x10xf32, #tpu.memory_space<vmem>>, %arg6: memref<8x2x10xf32, #tpu.memory_space<vmem>>, %arg7: memref<8x2x128xf32, #tpu.memory_space<vmem>>) attributes {dimension_semantics = [], scalar_prefetch = 0 : i64, scratch_operands = 1 : i64, tpu.core_type = #tpu.core_type<tc>} {
    %c0 = arith.constant 0 : index
    %c0_0 = arith.constant 0 : index
    %0 = vector.load %arg2[%c0, %c0_0] : memref<32x128xf32, #tpu.memory_space<vmem>>, vector<32x128xf32>
    %c0_1 = arith.constant 0 : index
    %c0_2 = arith.constant 0 : index
    %1 = vector.load %arg4[%c0_1, %c0_2] : memref<32x10xf32, #tpu.memory_space<vmem>>, vector<32x10xf32>
    %c0_3 = arith.constant 0 : index
    %c0_4 = arith.constant 0 : index
    %2 = vector.load %arg5[%c0_3, %c0_4] : memref<1x10xf32, #tpu.memory_space<vmem>>, vector<1x10xf32>
    %c0_5 = arith.constant 0 : index
    %c0_6 = arith.constant 0 : index
    %3 = vector.load %arg3[%c0_5, %c0_6] : memref<1x128xf32, #tpu.memory_space<vmem>>, vector<1x128xf32>
    %c0_7 = arith.constant 0 : index
    %c0_8 = arith.constant 0 : index
    %c0_9 = arith.constant 0 : index
    %4 = vector.load %arg0[%c0_7, %c0_8, %c0_9] : memref<8x2x1xf32, #tpu.memory_space<vmem>>, vector<8x2x1xf32>
    %c0_10 = arith.constant 0 : index
    %c0_11 = arith.constant 0 : index
    %5 = vector.load %arg1[%c0_10, %c0_11] : memref<1x128xf32, #tpu.memory_space<vmem>>, vector<1x128xf32>
    %6 = vector.shape_cast %5 : vector<1x128xf32> to vector<1x1x128xf32>
    %7 = vector.broadcast %4 : vector<8x2x1xf32> to vector<8x2x128xf32>
    %8 = vector.broadcast %6 : vector<1x1x128xf32> to vector<8x2x128xf32>
    %9 = arith.mulf %7, %8 : vector<8x2x128xf32>
    %10 = vector.shape_cast %3 : vector<1x128xf32> to vector<1x1x128xf32>
    %11 = vector.broadcast %10 : vector<1x1x128xf32> to vector<8x2x128xf32>
    %12 = arith.addf %9, %11 : vector<8x2x128xf32>
    %c0_12 = arith.constant 0 : index
    %c0_13 = arith.constant 0 : index
    %c0_14 = arith.constant 0 : index
    %13 = vector.load %arg7[%c0_12, %c0_13, %c0_14] : memref<8x2x128xf32, #tpu.memory_space<vmem>>, vector<8x2x128xf32>
    tpu.vector_store %arg7[%c0_12, %c0_13, %c0_14], %12 {strides = array<i32>} : memref<8x2x128xf32, #tpu.memory_space<vmem>>, vector<8x2x128xf32>,
    %cst = arith.constant 0.000000e+00 : f32
    %14 = vector.broadcast %cst : f32 to vector<2x32xf32>
    %cst_15 = arith.constant 0.000000e+00 : f32
    %15 = vector.broadcast %cst_15 : f32 to vector<2x32xf32>
    %c0_i32 = arith.constant 0 : i32
    %16 = arith.index_cast %c0_i32 : i32 to index
    %c0_16 = arith.constant 0 : index
    %c0_17 = arith.constant 0 : index
    %17 = vector.load %arg7[%16, %c0_16, %c0_17] : memref<8x2x128xf32, #tpu.memory_space<vmem>>, vector<1x2x128xf32>
    %18 = vector.shape_cast %17 : vector<1x2x128xf32> to vector<2x128xf32>
    %cst_18 = arith.constant dense<0.000000e+00> : vector<2x128xf32>
    %19 = tpu.matmul %14, %0, %cst_18 {dimension_numbers = #tpu.dot_dimension_numbers<[1], [0], [0], [1], [0, 0, 1, 1], [], []>} : vector<2x32xf32>, vector<32x128xf32>, vector<2x128xf32> -> vector<2x128xf32>
    %20 = arith.addf %18, %19 : vector<2x128xf32>
    %21 = arith.negf %20 : vector<2x128xf32>
    %22 = math.exp %21 : vector<2x128xf32>
    %cst_19 = arith.constant 1.000000e+00 : f32
    %23 = vector.broadcast %cst_19 : f32 to vector<2x128xf32>
    %24 = arith.addf %23, %22 : vector<2x128xf32>
    %25 = arith.divf %23, %24 : vector<2x128xf32>
    %26 = vector.extract_strided_slice %25 {offsets = [0, 0], sizes = [2, 32], strides = [1, 1]} : vector<2x128xf32> to vector<2x32xf32>
    %27 = vector.extract_strided_slice %25 {offsets = [0, 32], sizes = [2, 32], strides = [1, 1]} : vector<2x128xf32> to vector<2x32xf32>
    %28 = vector.extract_strided_slice %25 {offsets = [0, 96], sizes = [2, 32], strides = [1, 1]} : vector<2x128xf32> to vector<2x32xf32>
    %29 = vector.extract_strided_slice %20 {offsets = [0, 64], sizes = [2, 32], strides = [1, 1]} : vector<2x128xf32> to vector<2x32xf32>
    %30 = math.tanh %29 : vector<2x32xf32>
    %31 = arith.mulf %27, %15 : vector<2x32xf32>
    %32 = arith.mulf %26, %30 : vector<2x32xf32>
    %33 = arith.addf %31, %32 : vector<2x32xf32>
    %34 = math.tanh %33 : vector<2x32xf32>
    %35 = arith.mulf %28, %34 : vector<2x32xf32>
    %cst_20 = arith.constant dense<0.000000e+00> : vector<2x10xf32>
    %36 = tpu.matmul %35, %1, %cst_20 {dimension_numbers = #tpu.dot_dimension_numbers<[1], [0], [0], [1], [0, 0, 1, 1], [], []>} : vector<2x32xf32>, vector<32x10xf32>, vector<2x10xf32> -> vector<2x10xf32>
    %37 = vector.broadcast %2 : vector<1x10xf32> to vector<2x10xf32>
    %38 = arith.addf %36, %37 : vector<2x10xf32>
    %39 = arith.negf %38 : vector<2x10xf32>
    %40 = math.exp %39 : vector<2x10xf32>
    %cst_21 = arith.constant 1.000000e+00 : f32
    %41 = vector.broadcast %cst_21 : f32 to vector<2x10xf32>
    %42 = arith.addf %41, %40 : vector<2x10xf32>
    %43 = arith.divf %41, %42 : vector<2x10xf32>
    %44 = arith.index_cast %c0_i32 : i32 to index
    %c0_22 = arith.constant 0 : index
    %c0_23 = arith.constant 0 : index
    %45 = vector.load %arg6[%44, %c0_22, %c0_23] : memref<8x2x10xf32, #tpu.memory_space<vmem>>, vector<1x2x10xf32>
    %46 = vector.shape_cast %45 : vector<1x2x10xf32> to vector<2x10xf32>
    %47 = vector.shape_cast %43 : vector<2x10xf32> to vector<1x2x10xf32>
    tpu.vector_store %arg6[%44, %c0_22, %c0_23], %47 {strides = array<i32>} : memref<8x2x10xf32, #tpu.memory_space<vmem>>, vector<1x2x10xf32>,
    %c1_i32 = arith.constant 1 : i32
    %48 = arith.index_cast %c1_i32 : i32 to index
    %c0_24 = arith.constant 0 : index
    %c0_25 = arith.constant 0 : index
    %49 = vector.load %arg7[%48, %c0_24, %c0_25] : memref<8x2x128xf32, #tpu.memory_space<vmem>>, vector<1x2x128xf32>
    %50 = vector.shape_cast %49 : vector<1x2x128xf32> to vector<2x128xf32>
    %cst_26 = arith.constant dense<0.000000e+00> : vector<2x128xf32>
    %51 = tpu.matmul %35, %0, %cst_26 {dimension_numbers = #tpu.dot_dimension_numbers<[1], [0], [0], [1], [0, 0, 1, 1], [], []>} : vector<2x32xf32>, vector<32x128xf32>, vector<2x128xf32> -> vector<2x128xf32>
    %52 = arith.addf %50, %51 : vector<2x128xf32>
    %53 = arith.negf %52 : vector<2x128xf32>
    %54 = math.exp %53 : vector<2x128xf32>
    %cst_27 = arith.constant 1.000000e+00 : f32
    %55 = vector.broadcast %cst_27 : f32 to vector<2x128xf32>
    %56 = arith.addf %55, %54 : vector<2x128xf32>
    %57 = arith.divf %55, %56 : vector<2x128xf32>
    %58 = vector.extract_strided_slice %57 {offsets = [0, 0], sizes = [2, 32], strides = [1, 1]} : vector<2x128xf32> to vector<2x32xf32>
    %59 = vector.extract_strided_slice %57 {offsets = [0, 32], sizes = [2, 32], strides = [1, 1]} : vector<2x128xf32> to vector<2x32xf32>
    %60 = vector.extract_strided_slice %57 {offsets = [0, 96], sizes = [2, 32], strides = [1, 1]} : vector<2x128xf32> to vector<2x32xf32>
    %61 = vector.extract_strided_slice %52 {offsets = [0, 64], sizes = [2, 32], strides = [1, 1]} : vector<2x128xf32> to vector<2x32xf32>
    %62 = math.tanh %61 : vector<2x32xf32>
    %63 = arith.mulf %59, %33 : vector<2x32xf32>
    %64 = arith.mulf %58, %62 : vector<2x32xf32>
    %65 = arith.addf %63, %64 : vector<2x32xf32>
    %66 = math.tanh %65 : vector<2x32xf32>
    %67 = arith.mulf %60, %66 : vector<2x32xf32>
    %cst_28 = arith.constant dense<0.000000e+00> : vector<2x10xf32>
    %68 = tpu.matmul %67, %1, %cst_28 {dimension_numbers = #tpu.dot_dimension_numbers<[1], [0], [0], [1], [0, 0, 1, 1], [], []>} : vector<2x32xf32>, vector<32x10xf32>, vector<2x10xf32> -> vector<2x10xf32>
    %69 = vector.broadcast %2 : vector<1x10xf32> to vector<2x10xf32>
    %70 = arith.addf %68, %69 : vector<2x10xf32>
    %71 = arith.negf %70 : vector<2x10xf32>
    %72 = math.exp %71 : vector<2x10xf32>
    %cst_29 = arith.constant 1.000000e+00 : f32
    %73 = vector.broadcast %cst_29 : f32 to vector<2x10xf32>
    %74 = arith.addf %73, %72 : vector<2x10xf32>
    %75 = arith.divf %73, %74 : vector<2x10xf32>
    %76 = arith.index_cast %c1_i32 : i32 to index
    %c0_30 = arith.constant 0 : index
    %c0_31 = arith.constant 0 : index
    %77 = vector.load %arg6[%76, %c0_30, %c0_31] : memref<8x2x10xf32, #tpu.memory_space<vmem>>, vector<1x2x10xf32>
    %78 = vector.shape_cast %77 : vector<1x2x10xf32> to vector<2x10xf32>
    %79 = vector.shape_cast %75 : vector<2x10xf32> to vector<1x2x10xf32>
    tpu.vector_store %arg6[%76, %c0_30, %c0_31], %79 {strides = array<i32>} : memref<8x2x10xf32, #tpu.memory_space<vmem>>, vector<1x2x10xf32>,
    %c2_i32 = arith.constant 2 : i32
    %80 = arith.index_cast %c2_i32 : i32 to index
    %c0_32 = arith.constant 0 : index
    %c0_33 = arith.constant 0 : index
    %81 = vector.load %arg7[%80, %c0_32, %c0_33] : memref<8x2x128xf32, #tpu.memory_space<vmem>>, vector<1x2x128xf32>
    %82 = vector.shape_cast %81 : vector<1x2x128xf32> to vector<2x128xf32>
    %cst_34 = arith.constant dense<0.000000e+00> : vector<2x128xf32>
    %83 = tpu.matmul %67, %0, %cst_34 {dimension_numbers = #tpu.dot_dimension_numbers<[1], [0], [0], [1], [0, 0, 1, 1], [], []>} : vector<2x32xf32>, vector<32x128xf32>, vector<2x128xf32> -> vector<2x128xf32>
    %84 = arith.addf %82, %83 : vector<2x128xf32>
    %85 = arith.negf %84 : vector<2x128xf32>
    %86 = math.exp %85 : vector<2x128xf32>
    %cst_35 = arith.constant 1.000000e+00 : f32
    %87 = vector.broadcast %cst_35 : f32 to vector<2x128xf32>
    %88 = arith.addf %87, %86 : vector<2x128xf32>
    %89 = arith.divf %87, %88 : vector<2x128xf32>
    %90 = vector.extract_strided_slice %89 {offsets = [0, 0], sizes = [2, 32], strides = [1, 1]} : vector<2x128xf32> to vector<2x32xf32>
    %91 = vector.extract_strided_slice %89 {offsets = [0, 32], sizes = [2, 32], strides = [1, 1]} : vector<2x128xf32> to vector<2x32xf32>
    %92 = vector.extract_strided_slice %89 {offsets = [0, 96], sizes = [2, 32], strides = [1, 1]} : vector<2x128xf32> to vector<2x32xf32>
    %93 = vector.extract_strided_slice %84 {offsets = [0, 64], sizes = [2, 32], strides = [1, 1]} : vector<2x128xf32> to vector<2x32xf32>
    %94 = math.tanh %93 : vector<2x32xf32>
    %95 = arith.mulf %91, %65 : vector<2x32xf32>
    %96 = arith.mulf %90, %94 : vector<2x32xf32>
    %97 = arith.addf %95, %96 : vector<2x32xf32>
    %98 = math.tanh %97 : vector<2x32xf32>
    %99 = arith.mulf %92, %98 : vector<2x32xf32>
    %cst_36 = arith.constant dense<0.000000e+00> : vector<2x10xf32>
    %100 = tpu.matmul %99, %1, %cst_36 {dimension_numbers = #tpu.dot_dimension_numbers<[1], [0], [0], [1], [0, 0, 1, 1], [], []>} : vector<2x32xf32>, vector<32x10xf32>, vector<2x10xf32> -> vector<2x10xf32>
    %101 = vector.broadcast %2 : vector<1x10xf32> to vector<2x10xf32>
    %102 = arith.addf %100, %101 : vector<2x10xf32>
    %103 = arith.negf %102 : vector<2x10xf32>
    %104 = math.exp %103 : vector<2x10xf32>
    %cst_37 = arith.constant 1.000000e+00 : f32
    %105 = vector.broadcast %cst_37 : f32 to vector<2x10xf32>
    %106 = arith.addf %105, %104 : vector<2x10xf32>
    %107 = arith.divf %105, %106 : vector<2x10xf32>
    %108 = arith.index_cast %c2_i32 : i32 to index
    %c0_38 = arith.constant 0 : index
    %c0_39 = arith.constant 0 : index
    %109 = vector.load %arg6[%108, %c0_38, %c0_39] : memref<8x2x10xf32, #tpu.memory_space<vmem>>, vector<1x2x10xf32>
    %110 = vector.shape_cast %109 : vector<1x2x10xf32> to vector<2x10xf32>
    %111 = vector.shape_cast %107 : vector<2x10xf32> to vector<1x2x10xf32>
    tpu.vector_store %arg6[%108, %c0_38, %c0_39], %111 {strides = array<i32>} : memref<8x2x10xf32, #tpu.memory_space<vmem>>, vector<1x2x10xf32>,
    %c3_i32 = arith.constant 3 : i32
    %112 = arith.index_cast %c3_i32 : i32 to index
    %c0_40 = arith.constant 0 : index
    %c0_41 = arith.constant 0 : index
    %113 = vector.load %arg7[%112, %c0_40, %c0_41] : memref<8x2x128xf32, #tpu.memory_space<vmem>>, vector<1x2x128xf32>
    %114 = vector.shape_cast %113 : vector<1x2x128xf32> to vector<2x128xf32>
    %cst_42 = arith.constant dense<0.000000e+00> : vector<2x128xf32>
    %115 = tpu.matmul %99, %0, %cst_42 {dimension_numbers = #tpu.dot_dimension_numbers<[1], [0], [0], [1], [0, 0, 1, 1], [], []>} : vector<2x32xf32>, vector<32x128xf32>, vector<2x128xf32> -> vector<2x128xf32>
    %116 = arith.addf %114, %115 : vector<2x128xf32>
    %117 = arith.negf %116 : vector<2x128xf32>
    %118 = math.exp %117 : vector<2x128xf32>
    %cst_43 = arith.constant 1.000000e+00 : f32
    %119 = vector.broadcast %cst_43 : f32 to vector<2x128xf32>
    %120 = arith.addf %119, %118 : vector<2x128xf32>
    %121 = arith.divf %119, %120 : vector<2x128xf32>
    %122 = vector.extract_strided_slice %121 {offsets = [0, 0], sizes = [2, 32], strides = [1, 1]} : vector<2x128xf32> to vector<2x32xf32>
    %123 = vector.extract_strided_slice %121 {offsets = [0, 32], sizes = [2, 32], strides = [1, 1]} : vector<2x128xf32> to vector<2x32xf32>
    %124 = vector.extract_strided_slice %121 {offsets = [0, 96], sizes = [2, 32], strides = [1, 1]} : vector<2x128xf32> to vector<2x32xf32>
    %125 = vector.extract_strided_slice %116 {offsets = [0, 64], sizes = [2, 32], strides = [1, 1]} : vector<2x128xf32> to vector<2x32xf32>
    %126 = math.tanh %125 : vector<2x32xf32>
    %127 = arith.mulf %123, %97 : vector<2x32xf32>
    %128 = arith.mulf %122, %126 : vector<2x32xf32>
    %129 = arith.addf %127, %128 : vector<2x32xf32>
    %130 = math.tanh %129 : vector<2x32xf32>
    %131 = arith.mulf %124, %130 : vector<2x32xf32>
    %cst_44 = arith.constant dense<0.000000e+00> : vector<2x10xf32>
    %132 = tpu.matmul %131, %1, %cst_44 {dimension_numbers = #tpu.dot_dimension_numbers<[1], [0], [0], [1], [0, 0, 1, 1], [], []>} : vector<2x32xf32>, vector<32x10xf32>, vector<2x10xf32> -> vector<2x10xf32>
    %133 = vector.broadcast %2 : vector<1x10xf32> to vector<2x10xf32>
    %134 = arith.addf %132, %133 : vector<2x10xf32>
    %135 = arith.negf %134 : vector<2x10xf32>
    %136 = math.exp %135 : vector<2x10xf32>
    %cst_45 = arith.constant 1.000000e+00 : f32
    %137 = vector.broadcast %cst_45 : f32 to vector<2x10xf32>
    %138 = arith.addf %137, %136 : vector<2x10xf32>
    %139 = arith.divf %137, %138 : vector<2x10xf32>
    %140 = arith.index_cast %c3_i32 : i32 to index
    %c0_46 = arith.constant 0 : index
    %c0_47 = arith.constant 0 : index
    %141 = vector.load %arg6[%140, %c0_46, %c0_47] : memref<8x2x10xf32, #tpu.memory_space<vmem>>, vector<1x2x10xf32>
    %142 = vector.shape_cast %141 : vector<1x2x10xf32> to vector<2x10xf32>
    %143 = vector.shape_cast %139 : vector<2x10xf32> to vector<1x2x10xf32>
    tpu.vector_store %arg6[%140, %c0_46, %c0_47], %143 {strides = array<i32>} : memref<8x2x10xf32, #tpu.memory_space<vmem>>, vector<1x2x10xf32>,
    %c4_i32 = arith.constant 4 : i32
    %144 = arith.index_cast %c4_i32 : i32 to index
    %c0_48 = arith.constant 0 : index
    %c0_49 = arith.constant 0 : index
    %145 = vector.load %arg7[%144, %c0_48, %c0_49] : memref<8x2x128xf32, #tpu.memory_space<vmem>>, vector<1x2x128xf32>
    %146 = vector.shape_cast %145 : vector<1x2x128xf32> to vector<2x128xf32>
    %cst_50 = arith.constant dense<0.000000e+00> : vector<2x128xf32>
    %147 = tpu.matmul %131, %0, %cst_50 {dimension_numbers = #tpu.dot_dimension_numbers<[1], [0], [0], [1], [0, 0, 1, 1], [], []>} : vector<2x32xf32>, vector<32x128xf32>, vector<2x128xf32> -> vector<2x128xf32>
    %148 = arith.addf %146, %147 : vector<2x128xf32>
    %149 = arith.negf %148 : vector<2x128xf32>
    %150 = math.exp %149 : vector<2x128xf32>
    %cst_51 = arith.constant 1.000000e+00 : f32
    %151 = vector.broadcast %cst_51 : f32 to vector<2x128xf32>
    %152 = arith.addf %151, %150 : vector<2x128xf32>
    %153 = arith.divf %151, %152 : vector<2x128xf32>
    %154 = vector.extract_strided_slice %153 {offsets = [0, 0], sizes = [2, 32], strides = [1, 1]} : vector<2x128xf32> to vector<2x32xf32>
    %155 = vector.extract_strided_slice %153 {offsets = [0, 32], sizes = [2, 32], strides = [1, 1]} : vector<2x128xf32> to vector<2x32xf32>
    %156 = vector.extract_strided_slice %153 {offsets = [0, 96], sizes = [2, 32], strides = [1, 1]} : vector<2x128xf32> to vector<2x32xf32>
    %157 = vector.extract_strided_slice %148 {offsets = [0, 64], sizes = [2, 32], strides = [1, 1]} : vector<2x128xf32> to vector<2x32xf32>
    %158 = math.tanh %157 : vector<2x32xf32>
    %159 = arith.mulf %155, %129 : vector<2x32xf32>
    %160 = arith.mulf %154, %158 : vector<2x32xf32>
    %161 = arith.addf %159, %160 : vector<2x32xf32>
    %162 = math.tanh %161 : vector<2x32xf32>
    %163 = arith.mulf %156, %162 : vector<2x32xf32>
    %cst_52 = arith.constant dense<0.000000e+00> : vector<2x10xf32>
    %164 = tpu.matmul %163, %1, %cst_52 {dimension_numbers = #tpu.dot_dimension_numbers<[1], [0], [0], [1], [0, 0, 1, 1], [], []>} : vector<2x32xf32>, vector<32x10xf32>, vector<2x10xf32> -> vector<2x10xf32>
    %165 = vector.broadcast %2 : vector<1x10xf32> to vector<2x10xf32>
    %166 = arith.addf %164, %165 : vector<2x10xf32>
    %167 = arith.negf %166 : vector<2x10xf32>
    %168 = math.exp %167 : vector<2x10xf32>
    %cst_53 = arith.constant 1.000000e+00 : f32
    %169 = vector.broadcast %cst_53 : f32 to vector<2x10xf32>
    %170 = arith.addf %169, %168 : vector<2x10xf32>
    %171 = arith.divf %169, %170 : vector<2x10xf32>
    %172 = arith.index_cast %c4_i32 : i32 to index
    %c0_54 = arith.constant 0 : index
    %c0_55 = arith.constant 0 : index
    %173 = vector.load %arg6[%172, %c0_54, %c0_55] : memref<8x2x10xf32, #tpu.memory_space<vmem>>, vector<1x2x10xf32>
    %174 = vector.shape_cast %173 : vector<1x2x10xf32> to vector<2x10xf32>
    %175 = vector.shape_cast %171 : vector<2x10xf32> to vector<1x2x10xf32>
    tpu.vector_store %arg6[%172, %c0_54, %c0_55], %175 {strides = array<i32>} : memref<8x2x10xf32, #tpu.memory_space<vmem>>, vector<1x2x10xf32>,
    %c5_i32 = arith.constant 5 : i32
    %176 = arith.index_cast %c5_i32 : i32 to index
    %c0_56 = arith.constant 0 : index
    %c0_57 = arith.constant 0 : index
    %177 = vector.load %arg7[%176, %c0_56, %c0_57] : memref<8x2x128xf32, #tpu.memory_space<vmem>>, vector<1x2x128xf32>
    %178 = vector.shape_cast %177 : vector<1x2x128xf32> to vector<2x128xf32>
    %cst_58 = arith.constant dense<0.000000e+00> : vector<2x128xf32>
    %179 = tpu.matmul %163, %0, %cst_58 {dimension_numbers = #tpu.dot_dimension_numbers<[1], [0], [0], [1], [0, 0, 1, 1], [], []>} : vector<2x32xf32>, vector<32x128xf32>, vector<2x128xf32> -> vector<2x128xf32>
    %180 = arith.addf %178, %179 : vector<2x128xf32>
    %181 = arith.negf %180 : vector<2x128xf32>
    %182 = math.exp %181 : vector<2x128xf32>
    %cst_59 = arith.constant 1.000000e+00 : f32
    %183 = vector.broadcast %cst_59 : f32 to vector<2x128xf32>
    %184 = arith.addf %183, %182 : vector<2x128xf32>
    %185 = arith.divf %183, %184 : vector<2x128xf32>
    %186 = vector.extract_strided_slice %185 {offsets = [0, 0], sizes = [2, 32], strides = [1, 1]} : vector<2x128xf32> to vector<2x32xf32>
    %187 = vector.extract_strided_slice %185 {offsets = [0, 32], sizes = [2, 32], strides = [1, 1]} : vector<2x128xf32> to vector<2x32xf32>
    %188 = vector.extract_strided_slice %185 {offsets = [0, 96], sizes = [2, 32], strides = [1, 1]} : vector<2x128xf32> to vector<2x32xf32>
    %189 = vector.extract_strided_slice %180 {offsets = [0, 64], sizes = [2, 32], strides = [1, 1]} : vector<2x128xf32> to vector<2x32xf32>
    %190 = math.tanh %189 : vector<2x32xf32>
    %191 = arith.mulf %187, %161 : vector<2x32xf32>
    %192 = arith.mulf %186, %190 : vector<2x32xf32>
    %193 = arith.addf %191, %192 : vector<2x32xf32>
    %194 = math.tanh %193 : vector<2x32xf32>
    %195 = arith.mulf %188, %194 : vector<2x32xf32>
    %cst_60 = arith.constant dense<0.000000e+00> : vector<2x10xf32>
    %196 = tpu.matmul %195, %1, %cst_60 {dimension_numbers = #tpu.dot_dimension_numbers<[1], [0], [0], [1], [0, 0, 1, 1], [], []>} : vector<2x32xf32>, vector<32x10xf32>, vector<2x10xf32> -> vector<2x10xf32>
    %197 = vector.broadcast %2 : vector<1x10xf32> to vector<2x10xf32>
    %198 = arith.addf %196, %197 : vector<2x10xf32>
    %199 = arith.negf %198 : vector<2x10xf32>
    %200 = math.exp %199 : vector<2x10xf32>
    %cst_61 = arith.constant 1.000000e+00 : f32
    %201 = vector.broadcast %cst_61 : f32 to vector<2x10xf32>
    %202 = arith.addf %201, %200 : vector<2x10xf32>
    %203 = arith.divf %201, %202 : vector<2x10xf32>
    %204 = arith.index_cast %c5_i32 : i32 to index
    %c0_62 = arith.constant 0 : index
    %c0_63 = arith.constant 0 : index
    %205 = vector.load %arg6[%204, %c0_62, %c0_63] : memref<8x2x10xf32, #tpu.memory_space<vmem>>, vector<1x2x10xf32>
    %206 = vector.shape_cast %205 : vector<1x2x10xf32> to vector<2x10xf32>
    %207 = vector.shape_cast %203 : vector<2x10xf32> to vector<1x2x10xf32>
    tpu.vector_store %arg6[%204, %c0_62, %c0_63], %207 {strides = array<i32>} : memref<8x2x10xf32, #tpu.memory_space<vmem>>, vector<1x2x10xf32>,
    %c6_i32 = arith.constant 6 : i32
    %208 = arith.index_cast %c6_i32 : i32 to index
    %c0_64 = arith.constant 0 : index
    %c0_65 = arith.constant 0 : index
    %209 = vector.load %arg7[%208, %c0_64, %c0_65] : memref<8x2x128xf32, #tpu.memory_space<vmem>>, vector<1x2x128xf32>
    %210 = vector.shape_cast %209 : vector<1x2x128xf32> to vector<2x128xf32>
    %cst_66 = arith.constant dense<0.000000e+00> : vector<2x128xf32>
    %211 = tpu.matmul %195, %0, %cst_66 {dimension_numbers = #tpu.dot_dimension_numbers<[1], [0], [0], [1], [0, 0, 1, 1], [], []>} : vector<2x32xf32>, vector<32x128xf32>, vector<2x128xf32> -> vector<2x128xf32>
    %212 = arith.addf %210, %211 : vector<2x128xf32>
    %213 = arith.negf %212 : vector<2x128xf32>
    %214 = math.exp %213 : vector<2x128xf32>
    %cst_67 = arith.constant 1.000000e+00 : f32
    %215 = vector.broadcast %cst_67 : f32 to vector<2x128xf32>
    %216 = arith.addf %215, %214 : vector<2x128xf32>
    %217 = arith.divf %215, %216 : vector<2x128xf32>
    %218 = vector.extract_strided_slice %217 {offsets = [0, 0], sizes = [2, 32], strides = [1, 1]} : vector<2x128xf32> to vector<2x32xf32>
    %219 = vector.extract_strided_slice %217 {offsets = [0, 32], sizes = [2, 32], strides = [1, 1]} : vector<2x128xf32> to vector<2x32xf32>
    %220 = vector.extract_strided_slice %217 {offsets = [0, 96], sizes = [2, 32], strides = [1, 1]} : vector<2x128xf32> to vector<2x32xf32>
    %221 = vector.extract_strided_slice %212 {offsets = [0, 64], sizes = [2, 32], strides = [1, 1]} : vector<2x128xf32> to vector<2x32xf32>
    %222 = math.tanh %221 : vector<2x32xf32>
    %223 = arith.mulf %219, %193 : vector<2x32xf32>
    %224 = arith.mulf %218, %222 : vector<2x32xf32>
    %225 = arith.addf %223, %224 : vector<2x32xf32>
    %226 = math.tanh %225 : vector<2x32xf32>
    %227 = arith.mulf %220, %226 : vector<2x32xf32>
    %cst_68 = arith.constant dense<0.000000e+00> : vector<2x10xf32>
    %228 = tpu.matmul %227, %1, %cst_68 {dimension_numbers = #tpu.dot_dimension_numbers<[1], [0], [0], [1], [0, 0, 1, 1], [], []>} : vector<2x32xf32>, vector<32x10xf32>, vector<2x10xf32> -> vector<2x10xf32>
    %229 = vector.broadcast %2 : vector<1x10xf32> to vector<2x10xf32>
    %230 = arith.addf %228, %229 : vector<2x10xf32>
    %231 = arith.negf %230 : vector<2x10xf32>
    %232 = math.exp %231 : vector<2x10xf32>
    %cst_69 = arith.constant 1.000000e+00 : f32
    %233 = vector.broadcast %cst_69 : f32 to vector<2x10xf32>
    %234 = arith.addf %233, %232 : vector<2x10xf32>
    %235 = arith.divf %233, %234 : vector<2x10xf32>
    %236 = arith.index_cast %c6_i32 : i32 to index
    %c0_70 = arith.constant 0 : index
    %c0_71 = arith.constant 0 : index
    %237 = vector.load %arg6[%236, %c0_70, %c0_71] : memref<8x2x10xf32, #tpu.memory_space<vmem>>, vector<1x2x10xf32>
    %238 = vector.shape_cast %237 : vector<1x2x10xf32> to vector<2x10xf32>
    %239 = vector.shape_cast %235 : vector<2x10xf32> to vector<1x2x10xf32>
    tpu.vector_store %arg6[%236, %c0_70, %c0_71], %239 {strides = array<i32>} : memref<8x2x10xf32, #tpu.memory_space<vmem>>, vector<1x2x10xf32>,
    %c7_i32 = arith.constant 7 : i32
    %240 = arith.index_cast %c7_i32 : i32 to index
    %c0_72 = arith.constant 0 : index
    %c0_73 = arith.constant 0 : index
    %241 = vector.load %arg7[%240, %c0_72, %c0_73] : memref<8x2x128xf32, #tpu.memory_space<vmem>>, vector<1x2x128xf32>
    %242 = vector.shape_cast %241 : vector<1x2x128xf32> to vector<2x128xf32>
    %cst_74 = arith.constant dense<0.000000e+00> : vector<2x128xf32>
    %243 = tpu.matmul %227, %0, %cst_74 {dimension_numbers = #tpu.dot_dimension_numbers<[1], [0], [0], [1], [0, 0, 1, 1], [], []>} : vector<2x32xf32>, vector<32x128xf32>, vector<2x128xf32> -> vector<2x128xf32>
    %244 = arith.addf %242, %243 : vector<2x128xf32>
    %245 = arith.negf %244 : vector<2x128xf32>
    %246 = math.exp %245 : vector<2x128xf32>
    %cst_75 = arith.constant 1.000000e+00 : f32
    %247 = vector.broadcast %cst_75 : f32 to vector<2x128xf32>
    %248 = arith.addf %247, %246 : vector<2x128xf32>
    %249 = arith.divf %247, %248 : vector<2x128xf32>
    %250 = vector.extract_strided_slice %249 {offsets = [0, 0], sizes = [2, 32], strides = [1, 1]} : vector<2x128xf32> to vector<2x32xf32>
    %251 = vector.extract_strided_slice %249 {offsets = [0, 32], sizes = [2, 32], strides = [1, 1]} : vector<2x128xf32> to vector<2x32xf32>
    %252 = vector.extract_strided_slice %249 {offsets = [0, 96], sizes = [2, 32], strides = [1, 1]} : vector<2x128xf32> to vector<2x32xf32>
    %253 = vector.extract_strided_slice %244 {offsets = [0, 64], sizes = [2, 32], strides = [1, 1]} : vector<2x128xf32> to vector<2x32xf32>
    %254 = math.tanh %253 : vector<2x32xf32>
    %255 = arith.mulf %251, %225 : vector<2x32xf32>
    %256 = arith.mulf %250, %254 : vector<2x32xf32>
    %257 = arith.addf %255, %256 : vector<2x32xf32>
    %258 = math.tanh %257 : vector<2x32xf32>
    %259 = arith.mulf %252, %258 : vector<2x32xf32>
    %cst_76 = arith.constant dense<0.000000e+00> : vector<2x10xf32>
    %260 = tpu.matmul %259, %1, %cst_76 {dimension_numbers = #tpu.dot_dimension_numbers<[1], [0], [0], [1], [0, 0, 1, 1], [], []>} : vector<2x32xf32>, vector<32x10xf32>, vector<2x10xf32> -> vector<2x10xf32>
    %261 = vector.broadcast %2 : vector<1x10xf32> to vector<2x10xf32>
    %262 = arith.addf %260, %261 : vector<2x10xf32>
    %263 = arith.negf %262 : vector<2x10xf32>
    %264 = math.exp %263 : vector<2x10xf32>
    %cst_77 = arith.constant 1.000000e+00 : f32
    %265 = vector.broadcast %cst_77 : f32 to vector<2x10xf32>
    %266 = arith.addf %265, %264 : vector<2x10xf32>
    %267 = arith.divf %265, %266 : vector<2x10xf32>
    %268 = arith.index_cast %c7_i32 : i32 to index
    %c0_78 = arith.constant 0 : index
    %c0_79 = arith.constant 0 : index
    %269 = vector.load %arg6[%268, %c0_78, %c0_79] : memref<8x2x10xf32, #tpu.memory_space<vmem>>, vector<1x2x10xf32>
    %270 = vector.shape_cast %269 : vector<1x2x10xf32> to vector<2x10xf32>
    %271 = vector.shape_cast %267 : vector<2x10xf32> to vector<1x2x10xf32>
    tpu.vector_store %arg6[%268, %c0_78, %c0_79], %271 {strides = array<i32>} : memref<8x2x10xf32, #tpu.memory_space<vmem>>, vector<1x2x10xf32>,
    %c8_i32 = arith.constant 8 : i32
    return
  }
}

</mosaic_0001>

<bundles_post_ra>
// kernel: lstm_forecasting_pallas.1
= control target key start
LH: loop header
LB: loop body
LE: loop exit
PB: predicated region body
PF: predicated region fallthrough
CT: control target
= control target key end

     0   :  { %v2068_v0 = vmov 0.0|0.0   ;;  %vm2069_vm0 = vmmov 0   ;;  %v2070_v4 = vmov 0.0   ;;  %v2071_v7 = vmov 0   ;;  %s2072_s10 = smov 64   ;;  %s2384_s2 = inlined_call_operand.vmem [shape: f32[32,128], index: 2, kind: input, shape index: {}]   ;;  %s2385_s0 = inlined_call_operand.vmem [shape: f32[8,2,1], index: 0, kind: input, shape index: {}]   ;;  %s2386_s1 = inlined_call_operand.vmem [shape: f32[1,128], index: 1, kind: input, shape index: {}]   ;;  %s2387_s3 = inlined_call_operand.vmem [shape: f32[1,128], index: 3, kind: input, shape index: {}]   ;;  %s2388_s4 = inlined_call_operand.vmem [shape: f32[32,10], index: 4, kind: input, shape index: {}]   ;;  %s2389_s5 = inlined_call_operand.vmem [shape: f32[1,10], index: 5, kind: input, shape index: {}]   ;;  %s2390_s6 = inlined_call_operand.vmem [shape: f32[8,2,10], index: 6, kind: output, shape index: {}]  }
   0x1   :  { %1868 = vmatprep.subr.bf16.mxu0 %v2068_v0  ;;  %v23_v1 = vld [vmem:[%s2384_s2] sm:$0xff]  ;;  %v24_v2 = vld [vmem:[%s2384_s2 + $0x8] sm:$0xff]  ;;  %v25_v3 = vld [vmem:[%s2384_s2 + $0x10] sm:$0xff]  ;;  %1700 = vmatprep.mubr.msk.f32.mxu0 %vm2069_vm0, %v2070_v4  ;;  %vm119_vm1 = vcmask 261120   ;;  %vm305_vm2 = vcmask 74752  }
   0x2   :  { %v2121_v5 = vpack.c.bf16 %v24_v2, %v23_v1  ;;  %v26_v6 = vld [vmem:[%s2384_s2 + $0x18] sm:$0xff]  ;;  %1970 = vset.pattern.permute.xlu0 %v2071_v7  ;;  %v33_v8 = vld [vmem:[%s2385_s0] sm:$0x3]  ;;  %1874 = vmatprep.subr.bf16.mxu1 %v2068_v0  ;;  %v28_v30 = vld [vmem:[%s2388_s4 + $0x8] sm:$0xff] }
   0x3   :  { %44 = vperm.xlu0 %1970, %v33_v8   ;;  %1711 = vmatprep.mubr.msk.f32.mxu1 %vm2069_vm0, %v2070_v4  ;;  %v2133_v9 = vpack.c.bf16 %v26_v6, %v25_v3  ;;  %v2148_v10 = vld [vmem:[%s2386_s1] ss:$0 sm:$0xff]  ;;  %s2073_s1 = smov 32   ;;  %v29_v31 = vld [vmem:[%s2388_s4 + $0x10] sm:$0xff]  ;;  %v30_v33 = vld [vmem:[%s2388_s4 + $0x18] sm:$0xff] }
   0x4   :  { %1870 = vmatpush3.bf16.msra.mxu0 %v2121_v5  ;;  %1971 = vset.pattern.permute.xlu1 %v2071_v7  ;;  %v2153_v11 = vld [vmem:[%s2387_s3] ss:$0 sm:$0xff]  ;;  %v2177_v34 = vpack.c.bf16 %v30_v33, %v29_v31  ;;  %v34_v36 = vld [vmem:[%s2385_s0 + $0x2] sm:$0x3]  ;;  %v35_v3 = vld [vmem:[%s2385_s0 + $0x4] sm:$0x3] }
   0x5   :  { %1871 = vmatprep.subr.bf16.mxu0 %v2068_v0  ;;  %v27_v29 = vld [vmem:[%s2388_s4] sm:$0xff] }
   0x6   :  { %v2171_v32 = vpack.c.bf16 %v28_v30, %v27_v29  ;;  %v2206_v43 = vld [vmem:[%s2389_s5] ss:$0 sm:$0xff] }
   0x8   :  { %1873 = vmatpush3.bf16.msra.mxu0 %v2133_v9  ;;  %1876 = vmatpush3.bf16.msra.mxu1 %v2171_v32 }
   0x9   :  { %1880 = vmatprep.subr.bf16.mxu0 %v2068_v0  ;;  %1877 = vmatprep.subr.bf16.mxu1 %v2068_v0 }
   0xb   :  { %1701 = vmatmul.mubr.f32.vlgmr.msra.gmra.mrb[0].mxu0 %v2070_v4 }
   0xc   :  { %1882 = vmatpush3.bf16.msra.mxu0 %v2121_v5  ;;  %1722 = vmatprep.mubr.msk.f32.mxu0 %vm2069_vm0, %v2070_v4 }
   0xd   :  { %1883 = vmatprep.subr.bf16.mxu0 %v2068_v0  ;;  %1879 = vmatpush3.bf16.msra.mxu1 %v2177_v34 }
   0xe   :  { %1886 = vmatprep.subr.bf16.mxu1 %v2068_v0 }
  0x10   :  { %1885 = vmatpush3.bf16.msra.mxu0 %v2133_v9 }
  0x11   :  { %1892 = vmatprep.subr.bf16.mxu0 %v2068_v0 }
  0x82   :  { %v45_v12 = vpop.permute.xlu0 %44 }
  0x83   :  { %v88_v13 = vmul.f32 %v2148_v10, %v45_v12 }
  0x85   :  { %v102_v14 = vadd.f32 %v2153_v11, %v88_v13 }
  0x87   :  { %110 = vst [vmem:[#allocation2] sm:$0x3] %v102_v14 }
  0x8e   :  { %v118_v15 = vld [vmem:[#allocation2] sm:$0x3] }
  0xde   :  { %v189_v16 = vpop.f32.mrb[0].mxu0 }
  0xdf   :  { %v193_v17 = vadd.f32 %v189_v16, %v118_v15  ;;  %v1702_v18 = vpop.f32.mrb[1].mxu0 }
  0xe1   :  { %1972 = vtanh.f32 %v193_v17  ;;  %v1573_v20 = vmul.f32 -1.442695, %v193_v17 }
  0xe3   :  { %1974 = vpow2.f32 %v1573_v20 }
  0xeb   :  { %v1973_v19 = vpop.eup %1972 }
  0xec   :  { %203 = vrot.lane.b32.xlu0 %v1973_v19, %s2072_s10 }
  0xed   :  { %v1975_v21 = vpop.eup %1974 }
  0xee   :  { %v197_v22 = vadd.f32 1.0, %v1975_v21 }
  0xf0   :  { %1976 = vrcp.f32 %v197_v22 }
  0xfa   :  { %v1977_v23 = vpop.eup %1976 }
  0xfb   :  { %v201_v26 = vmul.f32 0.0, %v1977_v23 }
 0x15e   :  { %v204_v24 = vpop.permute.xlu0 %203 }
 0x15f   :  { %v206_v25 = vmul.f32 %v1977_v23, %v204_v24 }
 0x161   :  { %208 = vrot.lane.b32.xlu1 %v206_v25, %s2073_s1 }
 0x1d3   :  { %v209_v27 = vpop.permute.xlu1 %208 }
 0x1d4   :  { %v2159_v28 = vadd.f32 %v209_v27, %v201_v26 }
 0x1d6   :  { %1978 = vtanh.f32 %v2159_v28 }
 0x1e0   :  { %v1979_v35 = vpop.eup %1978 }
 0x1e1   :  { %214 = vrot.lane.b32.xlu1 %v1979_v35, %s2072_s10 }
 0x1e5   :  { %49 = vperm.xlu1 %1971, %v34_v36  }
 0x253   :  { %v215_v37 = vpop.permute.xlu1 %214 }
 0x254   :  { %v217_v38 = vmul.f32 %v1977_v23, %v215_v37 }
 0x256   :  { %225 = vrot.lane.b32.xlu0 %v217_v38, %s2073_s1 }
 0x264   :  { %v50_v40 = vpop.permute.xlu1 %49 }
 0x265   :  { %v89_v41 = vmul.f32 %v2148_v10, %v50_v40 }
 0x267   :  { %v103_v42 = vadd.f32 %v2153_v11, %v89_v41 }
 0x269   :  { %111 = vst [vmem:[#allocation2 + $0x2] sm:$0x3] %v103_v42 }
 0x270   :  { %v308_v44 = vld [vmem:[#allocation2 + $0x2] sm:$0x3] }
 0x2c8   :  { %v226_v39 = vpop.permute.xlu0 %225 }
 0x2c9   :  { %1712 = vmatmul.mubr.msk.f32.vlgmr.msra.gmra.mrb[0].mxu1 %vm119_vm1, %v226_v39  ;;  %1723 = vmatmul.mubr.msk.f32.vlgmr.msra.gmra.mrb[2].mxu0 %vm119_vm1, %v226_v39  ;;  %v36_v39 = vld [vmem:[%s2385_s0 + $0x6] sm:$0x3] }
 0x2ca   :  { %1888 = vmatpush3.bf16.msra.mxu1 %v2171_v32  ;;  %1894 = vmatpush3.bf16.msra.mxu0 %v2121_v5 }
 0x2cb   :  { %1889 = vmatprep.subr.bf16.mxu1 %v2068_v0  ;;  %1895 = vmatprep.subr.bf16.mxu0 %v2068_v0 }
 0x2cc   :  { %1733 = vmatprep.mubr.msk.f32.mxu1 %vm2069_vm0, %v2070_v4  ;;  %1744 = vmatprep.mubr.msk.f32.mxu0 %vm2069_vm0, %v2070_v4 }
 0x2ce   :  { %1891 = vmatpush3.bf16.msra.mxu1 %v2177_v34  ;;  %1897 = vmatpush3.bf16.msra.mxu0 %v2133_v9 }
 0x2cf   :  { %1898 = vmatprep.subr.bf16.mxu1 %v2068_v0  ;;  %1904 = vmatprep.subr.bf16.mxu0 %v2068_v0 }
 0x39c   :  { %v295_v45 = vpop.f32.mrb[0].mxu1  ;;  %v375_v46 = vpop.f32.mrb[2].mxu0 }
 0x39d   :  { %v296_v47 = vadd.f32 %v2206_v43, %v295_v45  ;;  %v379_v48 = vadd.f32 %v375_v46, %v308_v44  ;;  %v1713_v49 = vpop.f32.mrb[1].mxu1  ;;  %v1724_v50 = vpop.f32.mrb[3].mxu0 }
 0x39f   :  { %v1576_v51 = vmul.f32 -1.442695, %v296_v47  ;;  %1980 = vtanh.f32 %v379_v48  ;;  %v1578_v56 = vmul.f32 -1.442695, %v379_v48 }
 0x3a1   :  { %1982 = vpow2.f32 %v1576_v51 }
 0x3a9   :  { %v1981_v52 = vpop.eup %1980 }
 0x3aa   :  { %389 = vrot.lane.b32.xlu0 %v1981_v52, %s2072_s10 }
 0x3ab   :  { %v1983_v53 = vpop.eup %1982 }
 0x3ac   :  { %v302_v54 = vadd.f32 1.0, %v1983_v53 }
 0x3ae   :  { %1984 = vrcp.f32 %v302_v54 }
 0x3af   :  { %1986 = vpow2.f32 %v1578_v56 }
 0x3b8   :  { %v1985_v55 = vpop.eup %1984 }
 0x3b9   :  { %306 = vst.msk [vmem:[%s2390_s6] sm:$0x3] %vm305_vm2, %v1985_v55  ;;  %v1987_v57 = vpop.eup %1986 }
 0x3ba   :  { %v383_v58 = vadd.f32 1.0, %v1987_v57 }
 0x3bc   :  { %1988 = vrcp.f32 %v383_v58 }
 0x3c6   :  { %v1989_v59 = vpop.eup %1988 }
 0x3c7   :  { %v387_v62 = vmul.f32 %v1989_v59, %v2159_v28 }
 0x41c   :  { %v390_v60 = vpop.permute.xlu0 %389 }
 0x41d   :  { %v392_v61 = vmul.f32 %v1989_v59, %v390_v60 }
 0x41f   :  { %394 = vrot.lane.b32.xlu1 %v392_v61, %s2073_s1 }
 0x491   :  { %v395_v63 = vpop.permute.xlu1 %394 }
 0x492   :  { %v397_v1 = vadd.f32 %v395_v63, %v387_v62 }
 0x494   :  { %1990 = vtanh.f32 %v397_v1 }
 0x49e   :  { %v1991_v2 = vpop.eup %1990 }
 0x49f   :  { %400 = vrot.lane.b32.xlu0 %v1991_v2, %s2072_s10 }
 0x4a3   :  { %54 = vperm.xlu0 %1970, %v35_v3  }
 0x511   :  { %v401_v6 = vpop.permute.xlu0 %400 }
 0x512   :  { %v403_v7 = vmul.f32 %v1989_v59, %v401_v6 }
 0x514   :  { %405 = vrot.lane.b32.xlu1 %v403_v7, %s2073_s1 }
 0x522   :  { %v55_v8 = vpop.permute.xlu0 %54 }
 0x523   :  { %v90_v12 = vmul.f32 %v2148_v10, %v55_v8  ;;  %v37_v8 = vld [vmem:[%s2385_s0 + $0x8] sm:$0x3] }
 0x525   :  { %v104_v13 = vadd.f32 %v2153_v11, %v90_v12 }
 0x527   :  { %112 = vst [vmem:[#allocation2 + $0x4] sm:$0x3] %v104_v13 }
 0x52e   :  { %v488_v16 = vld [vmem:[#allocation2 + $0x4] sm:$0x3] }
 0x586   :  { %v406_v14 = vpop.permute.xlu1 %405 }
 0x587   :  { %1734 = vmatmul.mubr.msk.f32.vlgmr.msra.gmra.mrb[2].mxu1 %vm119_vm1, %v406_v14  ;;  %1745 = vmatmul.mubr.msk.f32.vlgmr.msra.gmra.mrb[4].mxu0 %vm119_vm1, %v406_v14 }
 0x588   :  { %1900 = vmatpush3.bf16.msra.mxu1 %v2171_v32  ;;  %1906 = vmatpush3.bf16.msra.mxu0 %v2121_v5 }
 0x589   :  { %1901 = vmatprep.subr.bf16.mxu1 %v2068_v0  ;;  %1907 = vmatprep.subr.bf16.mxu0 %v2068_v0 }
 0x58a   :  { %1755 = vmatprep.mubr.msk.f32.mxu1 %vm2069_vm0, %v2070_v4  ;;  %1766 = vmatprep.mubr.msk.f32.mxu0 %vm2069_vm0, %v2070_v4 }
 0x58c   :  { %1903 = vmatpush3.bf16.msra.mxu1 %v2177_v34  ;;  %1909 = vmatpush3.bf16.msra.mxu0 %v2133_v9 }
 0x58d   :  { %1910 = vmatprep.subr.bf16.mxu1 %v2068_v0  ;;  %1916 = vmatprep.subr.bf16.mxu0 %v2068_v0 }
 0x65a   :  { %v475_v15 = vpop.f32.mrb[2].mxu1  ;;  %v555_v17 = vpop.f32.mrb[4].mxu0 }
 0x65b   :  { %v476_v18 = vadd.f32 %v2206_v43, %v475_v15  ;;  %v559_v19 = vadd.f32 %v555_v17, %v488_v16  ;;  %v1735_v20 = vpop.f32.mrb[3].mxu1  ;;  %v1746_v21 = vpop.f32.mrb[5].mxu0 }
 0x65d   :  { %v1580_v22 = vmul.f32 -1.442695, %v476_v18  ;;  %1992 = vtanh.f32 %v559_v19  ;;  %v1583_v27 = vmul.f32 -1.442695, %v559_v19 }
 0x65f   :  { %1994 = vpow2.f32 %v1580_v22 }
 0x667   :  { %v1993_v23 = vpop.eup %1992 }
 0x668   :  { %569 = vrot.lane.b32.xlu1 %v1993_v23, %s2072_s10 }
 0x669   :  { %v1995_v24 = vpop.eup %1994 }
 0x66a   :  { %v482_v25 = vadd.f32 1.0, %v1995_v24 }
 0x66c   :  { %1996 = vrcp.f32 %v482_v25 }
 0x66d   :  { %1998 = vpow2.f32 %v1583_v27 }
 0x676   :  { %v1997_v26 = vpop.eup %1996 }
 0x677   :  { %1581 = vst.msk [vmem:[%s2390_s6 + $0x2] sm:$0x3] %vm305_vm2, %v1997_v26  ;;  %v1999_v28 = vpop.eup %1998 }
 0x678   :  { %v563_v29 = vadd.f32 1.0, %v1999_v28 }
 0x67a   :  { %2000 = vrcp.f32 %v563_v29 }
 0x684   :  { %v2001_v30 = vpop.eup %2000 }
 0x685   :  { %v567_v35 = vmul.f32 %v2001_v30, %v397_v1 }
 0x6da   :  { %v570_v31 = vpop.permute.xlu1 %569 }
 0x6db   :  { %v572_v33 = vmul.f32 %v2001_v30, %v570_v31 }
 0x6dd   :  { %574 = vrot.lane.b32.xlu0 %v572_v33, %s2073_s1 }
 0x74f   :  { %v575_v36 = vpop.permute.xlu0 %574 }
 0x750   :  { %v577_v37 = vadd.f32 %v575_v36, %v567_v35 }
 0x752   :  { %2002 = vtanh.f32 %v577_v37 }
 0x75c   :  { %v2003_v38 = vpop.eup %2002 }
 0x75d   :  { %580 = vrot.lane.b32.xlu1 %v2003_v38, %s2072_s10 }
 0x761   :  { %59 = vperm.xlu1 %1971, %v36_v39  }
 0x7cf   :  { %v581_v40 = vpop.permute.xlu1 %580 }
 0x7d0   :  { %v583_v41 = vmul.f32 %v2001_v30, %v581_v40 }
 0x7d2   :  { %585 = vrot.lane.b32.xlu0 %v583_v41, %s2073_s1 }
 0x7e0   :  { %v60_v42 = vpop.permute.xlu1 %59 }
 0x7e1   :  { %v91_v44 = vmul.f32 %v2148_v10, %v60_v42  ;;  %v38_v42 = vld [vmem:[%s2385_s0 + $0xa] sm:$0x3] }
 0x7e3   :  { %v105_v45 = vadd.f32 %v2153_v11, %v91_v44 }
 0x7e5   :  { %113 = vst [vmem:[#allocation2 + $0x6] sm:$0x3] %v105_v45 }
 0x7ec   :  { %v668_v48 = vld [vmem:[#allocation2 + $0x6] sm:$0x3] }
 0x844   :  { %v586_v46 = vpop.permute.xlu0 %585 }
 0x845   :  { %1756 = vmatmul.mubr.msk.f32.vlgmr.msra.gmra.mrb[4].mxu1 %vm119_vm1, %v586_v46  ;;  %1767 = vmatmul.mubr.msk.f32.vlgmr.msra.gmra.mrb[6].mxu0 %vm119_vm1, %v586_v46 }
 0x846   :  { %1912 = vmatpush3.bf16.msra.mxu1 %v2171_v32  ;;  %1918 = vmatpush3.bf16.msra.mxu0 %v2121_v5 }
 0x847   :  { %1913 = vmatprep.subr.bf16.mxu1 %v2068_v0  ;;  %1919 = vmatprep.subr.bf16.mxu0 %v2068_v0 }
 0x848   :  { %1777 = vmatprep.mubr.msk.f32.mxu1 %vm2069_vm0, %v2070_v4  ;;  %1788 = vmatprep.mubr.msk.f32.mxu0 %vm2069_vm0, %v2070_v4 }
 0x84a   :  { %1915 = vmatpush3.bf16.msra.mxu1 %v2177_v34  ;;  %1921 = vmatpush3.bf16.msra.mxu0 %v2133_v9 }
 0x84b   :  { %1922 = vmatprep.subr.bf16.mxu1 %v2068_v0  ;;  %1928 = vmatprep.subr.bf16.mxu0 %v2068_v0 }
 0x918   :  { %v655_v47 = vpop.f32.mrb[4].mxu1  ;;  %v735_v49 = vpop.f32.mrb[6].mxu0 }
 0x919   :  { %v656_v50 = vadd.f32 %v2206_v43, %v655_v47  ;;  %v739_v51 = vadd.f32 %v735_v49, %v668_v48  ;;  %v1757_v52 = vpop.f32.mrb[5].mxu1  ;;  %v1768_v53 = vpop.f32.mrb[7].mxu0 }
 0x91b   :  { %v1585_v54 = vmul.f32 -1.442695, %v656_v50  ;;  %2004 = vtanh.f32 %v739_v51  ;;  %v1588_v59 = vmul.f32 -1.442695, %v739_v51 }
 0x91d   :  { %2006 = vpow2.f32 %v1585_v54 }
 0x925   :  { %v2005_v55 = vpop.eup %2004 }
 0x926   :  { %749 = vrot.lane.b32.xlu0 %v2005_v55, %s2072_s10 }
 0x927   :  { %v2007_v56 = vpop.eup %2006 }
 0x928   :  { %v662_v57 = vadd.f32 1.0, %v2007_v56 }
 0x92a   :  { %2008 = vrcp.f32 %v662_v57 }
 0x92b   :  { %2010 = vpow2.f32 %v1588_v59 }
 0x934   :  { %v2009_v58 = vpop.eup %2008 }
 0x935   :  { %1586 = vst.msk [vmem:[%s2390_s6 + $0x4] sm:$0x3] %vm305_vm2, %v2009_v58  ;;  %v2011_v60 = vpop.eup %2010 }
 0x936   :  { %v743_v61 = vadd.f32 1.0, %v2011_v60 }
 0x938   :  { %2012 = vrcp.f32 %v743_v61 }
 0x942   :  { %v2013_v62 = vpop.eup %2012 }
 0x943   :  { %v747_v2 = vmul.f32 %v2013_v62, %v577_v37 }
 0x998   :  { %v750_v63 = vpop.permute.xlu0 %749 }
 0x999   :  { %v752_v1 = vmul.f32 %v2013_v62, %v750_v63 }
 0x99b   :  { %754 = vrot.lane.b32.xlu1 %v752_v1, %s2073_s1 }
 0xa0d   :  { %v755_v3 = vpop.permute.xlu1 %754 }
 0xa0e   :  { %v757_v6 = vadd.f32 %v755_v3, %v747_v2 }
 0xa10   :  { %2014 = vtanh.f32 %v757_v6 }
 0xa1a   :  { %v2015_v7 = vpop.eup %2014 }
 0xa1b   :  { %760 = vrot.lane.b32.xlu0 %v2015_v7, %s2072_s10 }
 0xa1f   :  { %64 = vperm.xlu0 %1970, %v37_v8  }
 0xa8d   :  { %v761_v12 = vpop.permute.xlu0 %760 }
 0xa8e   :  { %v763_v13 = vmul.f32 %v2013_v62, %v761_v12 }
 0xa90   :  { %765 = vrot.lane.b32.xlu1 %v763_v13, %s2073_s1 }
 0xa9e   :  { %v65_v14 = vpop.permute.xlu0 %64 }
 0xa9f   :  { %v92_v15 = vmul.f32 %v2148_v10, %v65_v14  ;;  %v39_v14 = vld [vmem:[%s2385_s0 + $0xc] sm:$0x3] }
 0xaa1   :  { %v106_v16 = vadd.f32 %v2153_v11, %v92_v15 }
 0xaa3   :  { %114 = vst [vmem:[#allocation2 + $0x8] sm:$0x3] %v106_v16 }
 0xaaa   :  { %v848_v19 = vld [vmem:[#allocation2 + $0x8] sm:$0x3] }
 0xb02   :  { %v766_v17 = vpop.permute.xlu1 %765 }
 0xb03   :  { %1778 = vmatmul.mubr.msk.f32.vlgmr.msra.gmra.mrb[6].mxu1 %vm119_vm1, %v766_v17  ;;  %1789 = vmatmul.mubr.msk.f32.vlgmr.msra.gmra.mrb[8].mxu0 %vm119_vm1, %v766_v17 }
 0xb04   :  { %1924 = vmatpush3.bf16.msra.mxu1 %v2171_v32  ;;  %1930 = vmatpush3.bf16.msra.mxu0 %v2121_v5 }
 0xb05   :  { %1925 = vmatprep.subr.bf16.mxu1 %v2068_v0  ;;  %1931 = vmatprep.subr.bf16.mxu0 %v2068_v0 }
 0xb06   :  { %1799 = vmatprep.mubr.msk.f32.mxu1 %vm2069_vm0, %v2070_v4  ;;  %1810 = vmatprep.mubr.msk.f32.mxu0 %vm2069_vm0, %v2070_v4 }
 0xb08   :  { %1927 = vmatpush3.bf16.msra.mxu1 %v2177_v34  ;;  %1933 = vmatpush3.bf16.msra.mxu0 %v2133_v9 }
 0xb09   :  { %1934 = vmatprep.subr.bf16.mxu1 %v2068_v0  ;;  %1940 = vmatprep.subr.bf16.mxu0 %v2068_v0 }
 0xbd6   :  { %v835_v18 = vpop.f32.mrb[6].mxu1  ;;  %v915_v20 = vpop.f32.mrb[8].mxu0 }
 0xbd7   :  { %v836_v21 = vadd.f32 %v2206_v43, %v835_v18  ;;  %v919_v22 = vadd.f32 %v915_v20, %v848_v19  ;;  %v1779_v23 = vpop.f32.mrb[7].mxu1  ;;  %v1790_v24 = vpop.f32.mrb[9].mxu0 }
 0xbd9   :  { %v1590_v25 = vmul.f32 -1.442695, %v836_v21  ;;  %2016 = vtanh.f32 %v919_v22  ;;  %v1593_v30 = vmul.f32 -1.442695, %v919_v22 }
 0xbdb   :  { %2018 = vpow2.f32 %v1590_v25 }
 0xbe3   :  { %v2017_v26 = vpop.eup %2016 }
 0xbe4   :  { %929 = vrot.lane.b32.xlu1 %v2017_v26, %s2072_s10 }
 0xbe5   :  { %v2019_v27 = vpop.eup %2018 }
 0xbe6   :  { %v842_v28 = vadd.f32 1.0, %v2019_v27 }
 0xbe8   :  { %2020 = vrcp.f32 %v842_v28 }
 0xbe9   :  { %2022 = vpow2.f32 %v1593_v30 }
 0xbf2   :  { %v2021_v29 = vpop.eup %2020 }
 0xbf3   :  { %1591 = vst.msk [vmem:[%s2390_s6 + $0x6] sm:$0x3] %vm305_vm2, %v2021_v29  ;;  %v2023_v31 = vpop.eup %2022 }
 0xbf4   :  { %v923_v33 = vadd.f32 1.0, %v2023_v31 }
 0xbf6   :  { %2024 = vrcp.f32 %v923_v33 }
 0xc00   :  { %v2025_v35 = vpop.eup %2024 }
 0xc01   :  { %v927_v38 = vmul.f32 %v2025_v35, %v757_v6 }
 0xc56   :  { %v930_v36 = vpop.permute.xlu1 %929 }
 0xc57   :  { %v932_v37 = vmul.f32 %v2025_v35, %v930_v36 }
 0xc59   :  { %934 = vrot.lane.b32.xlu0 %v932_v37, %s2073_s1 }
 0xccb   :  { %v935_v39 = vpop.permute.xlu0 %934 }
 0xccc   :  { %v937_v40 = vadd.f32 %v935_v39, %v927_v38 }
 0xcce   :  { %2026 = vtanh.f32 %v937_v40 }
 0xcd8   :  { %v2027_v41 = vpop.eup %2026 }
 0xcd9   :  { %940 = vrot.lane.b32.xlu1 %v2027_v41, %s2072_s10 }
 0xcdd   :  { %69 = vperm.xlu1 %1971, %v38_v42  }
 0xd4b   :  { %v941_v44 = vpop.permute.xlu1 %940 }
 0xd4c   :  { %v943_v45 = vmul.f32 %v2025_v35, %v941_v44  ;;  %v40_v44 = vld [vmem:[%s2385_s0 + $0xe] sm:$0x3] }
 0xd4e   :  { %945 = vrot.lane.b32.xlu0 %v943_v45, %s2073_s1 }
 0xd5c   :  { %v70_v46 = vpop.permute.xlu1 %69 }
 0xd5d   :  { %v93_v47 = vmul.f32 %v2148_v10, %v70_v46 }
 0xd5f   :  { %v107_v48 = vadd.f32 %v2153_v11, %v93_v47 }
 0xd61   :  { %115 = vst [vmem:[#allocation2 + $0xa] sm:$0x3] %v107_v48 }
 0xd68   :  { %v1028_v51 = vld [vmem:[#allocation2 + $0xa] sm:$0x3] }
 0xdc0   :  { %v946_v49 = vpop.permute.xlu0 %945 }
 0xdc1   :  { %1800 = vmatmul.mubr.msk.f32.vlgmr.msra.gmra.mrb[8].mxu1 %vm119_vm1, %v946_v49  ;;  %1811 = vmatmul.mubr.msk.f32.vlgmr.msra.gmra.mrb[10].mxu0 %vm119_vm1, %v946_v49 }
 0xdc2   :  { %1936 = vmatpush3.bf16.msra.mxu1 %v2171_v32  ;;  %1942 = vmatpush3.bf16.msra.mxu0 %v2121_v5 }
 0xdc3   :  { %1937 = vmatprep.subr.bf16.mxu1 %v2068_v0  ;;  %1943 = vmatprep.subr.bf16.mxu0 %v2068_v0 }
 0xdc4   :  { %1821 = vmatprep.mubr.msk.f32.mxu1 %vm2069_vm0, %v2070_v4  ;;  %1832 = vmatprep.mubr.msk.f32.mxu0 %vm2069_vm0, %v2070_v4 }
 0xdc6   :  { %1939 = vmatpush3.bf16.msra.mxu1 %v2177_v34  ;;  %1945 = vmatpush3.bf16.msra.mxu0 %v2133_v9 }
 0xdc7   :  { %1946 = vmatprep.subr.bf16.mxu1 %v2068_v0  ;;  %1952 = vmatprep.subr.bf16.mxu0 %v2068_v0 }
 0xe94   :  { %v1015_v50 = vpop.f32.mrb[8].mxu1  ;;  %v1095_v52 = vpop.f32.mrb[10].mxu0 }
 0xe95   :  { %v1016_v53 = vadd.f32 %v2206_v43, %v1015_v50  ;;  %v1099_v54 = vadd.f32 %v1095_v52, %v1028_v51  ;;  %v1801_v55 = vpop.f32.mrb[9].mxu1  ;;  %v1812_v56 = vpop.f32.mrb[11].mxu0 }
 0xe97   :  { %v1595_v57 = vmul.f32 -1.442695, %v1016_v53  ;;  %2028 = vtanh.f32 %v1099_v54  ;;  %v1598_v62 = vmul.f32 -1.442695, %v1099_v54 }
 0xe99   :  { %2030 = vpow2.f32 %v1595_v57 }
 0xea1   :  { %v2029_v58 = vpop.eup %2028 }
 0xea2   :  { %1109 = vrot.lane.b32.xlu0 %v2029_v58, %s2072_s10 }
 0xea3   :  { %v2031_v59 = vpop.eup %2030 }
 0xea4   :  { %v1022_v60 = vadd.f32 1.0, %v2031_v59 }
 0xea6   :  { %2032 = vrcp.f32 %v1022_v60 }
 0xea7   :  { %2034 = vpow2.f32 %v1598_v62 }
 0xeb0   :  { %v2033_v61 = vpop.eup %2032 }
 0xeb1   :  { %1596 = vst.msk [vmem:[%s2390_s6 + $0x8] sm:$0x3] %vm305_vm2, %v2033_v61  ;;  %v2035_v63 = vpop.eup %2034 }
 0xeb2   :  { %v1103_v1 = vadd.f32 1.0, %v2035_v63 }
 0xeb4   :  { %2036 = vrcp.f32 %v1103_v1 }
 0xebe   :  { %v2037_v2 = vpop.eup %2036 }
 0xebf   :  { %v1107_v7 = vmul.f32 %v2037_v2, %v937_v40 }
 0xf14   :  { %v1110_v3 = vpop.permute.xlu0 %1109 }
 0xf15   :  { %v1112_v6 = vmul.f32 %v2037_v2, %v1110_v3 }
 0xf17   :  { %1114 = vrot.lane.b32.xlu1 %v1112_v6, %s2073_s1 }
 0xf89   :  { %v1115_v8 = vpop.permute.xlu1 %1114 }
 0xf8a   :  { %v1117_v12 = vadd.f32 %v1115_v8, %v1107_v7 }
 0xf8c   :  { %2038 = vtanh.f32 %v1117_v12 }
 0xf96   :  { %v2039_v13 = vpop.eup %2038 }
 0xf97   :  { %1120 = vrot.lane.b32.xlu0 %v2039_v13, %s2072_s10 }
 0xf9b   :  { %74 = vperm.xlu0 %1970, %v39_v14  }
0x1009   :  { %v1121_v15 = vpop.permute.xlu0 %1120 }
0x100a   :  { %v1123_v16 = vmul.f32 %v2037_v2, %v1121_v15 }
0x100c   :  { %1125 = vrot.lane.b32.xlu1 %v1123_v16, %s2073_s1 }
0x101a   :  { %v75_v17 = vpop.permute.xlu0 %74 }
0x101b   :  { %v94_v18 = vmul.f32 %v2148_v10, %v75_v17 }
0x101d   :  { %v108_v19 = vadd.f32 %v2153_v11, %v94_v18 }
0x101f   :  { %116 = vst [vmem:[#allocation2 + $0xc] sm:$0x3] %v108_v19 }
0x1026   :  { %v1208_v22 = vld [vmem:[#allocation2 + $0xc] sm:$0x3] }
0x107e   :  { %v1126_v20 = vpop.permute.xlu1 %1125 }
0x107f   :  { %1822 = vmatmul.mubr.msk.f32.vlgmr.msra.gmra.mrb[10].mxu1 %vm119_vm1, %v1126_v20  ;;  %1833 = vmatmul.mubr.msk.f32.vlgmr.msra.gmra.mrb[12].mxu0 %vm119_vm1, %v1126_v20 }
0x1080   :  { %1948 = vmatpush3.bf16.msra.mxu1 %v2171_v32  ;;  %1954 = vmatpush3.bf16.msra.mxu0 %v2121_v5 }
0x1081   :  { %1949 = vmatprep.subr.bf16.mxu1 %v2068_v0  ;;  %1955 = vmatprep.subr.bf16.mxu0 %v2068_v0 }
0x1082   :  { %1843 = vmatprep.mubr.msk.f32.mxu1 %vm2069_vm0, %v2070_v4  ;;  %1854 = vmatprep.mubr.msk.f32.mxu0 %vm2069_vm0, %v2070_v4 }
0x1084   :  { %1951 = vmatpush3.bf16.msra.mxu1 %v2177_v34  ;;  %1957 = vmatpush3.bf16.msra.mxu0 %v2133_v9 }
0x1085   :  { %1958 = vmatprep.subr.bf16.mxu1 %v2068_v0 }
0x1152   :  { %v1195_v21 = vpop.f32.mrb[10].mxu1  ;;  %v1275_v23 = vpop.f32.mrb[12].mxu0 }
0x1153   :  { %v1196_v5 = vadd.f32 %v2206_v43, %v1195_v21  ;;  %v1279_v24 = vadd.f32 %v1275_v23, %v1208_v22  ;;  %v1823_v25 = vpop.f32.mrb[11].mxu1  ;;  %v1834_v26 = vpop.f32.mrb[13].mxu0 }
0x1155   :  { %v1600_v27 = vmul.f32 -1.442695, %v1196_v5  ;;  %2040 = vtanh.f32 %v1279_v24  ;;  %v1603_v31 = vmul.f32 -1.442695, %v1279_v24 }
0x1157   :  { %2042 = vpow2.f32 %v1600_v27 }
0x115f   :  { %v2041_v28 = vpop.eup %2040 }
0x1160   :  { %1289 = vrot.lane.b32.xlu1 %v2041_v28, %s2072_s10 }
0x1161   :  { %v2043_v29 = vpop.eup %2042 }
0x1162   :  { %v1202_v30 = vadd.f32 1.0, %v2043_v29 }
0x1164   :  { %2044 = vrcp.f32 %v1202_v30 }
0x1165   :  { %2046 = vpow2.f32 %v1603_v31 }
0x116e   :  { %v2045_v9 = vpop.eup %2044 }
0x116f   :  { %1601 = vst.msk [vmem:[%s2390_s6 + $0xa] sm:$0x3] %vm305_vm2, %v2045_v9  ;;  %v2047_v33 = vpop.eup %2046 }
0x1170   :  { %v1283_v35 = vadd.f32 1.0, %v2047_v33 }
0x1172   :  { %2048 = vrcp.f32 %v1283_v35 }
0x117c   :  { %v2049_v36 = vpop.eup %2048 }
0x117d   :  { %v1287_v39 = vmul.f32 %v2049_v36, %v1117_v12 }
0x11d2   :  { %v1290_v37 = vpop.permute.xlu1 %1289 }
0x11d3   :  { %v1292_v38 = vmul.f32 %v2049_v36, %v1290_v37 }
0x11d5   :  { %1294 = vrot.lane.b32.xlu0 %v1292_v38, %s2073_s1 }
0x1247   :  { %v1295_v40 = vpop.permute.xlu0 %1294 }
0x1248   :  { %v1297_v41 = vadd.f32 %v1295_v40, %v1287_v39 }
0x124a   :  { %2050 = vtanh.f32 %v1297_v41 }
0x1254   :  { %v2051_v42 = vpop.eup %2050 }
0x1255   :  { %1300 = vrot.lane.b32.xlu1 %v2051_v42, %s2072_s10 }
0x1259   :  { %79 = vperm.xlu1 %1971, %v40_v44  }
0x12c7   :  { %v1301_v45 = vpop.permute.xlu1 %1300 }
0x12c8   :  { %v1303_v46 = vmul.f32 %v2049_v36, %v1301_v45 }
0x12ca   :  { %1305 = vrot.lane.b32.xlu0 %v1303_v46, %s2073_s1 }
0x12d8   :  { %v80_v47 = vpop.permute.xlu1 %79 }
0x12d9   :  { %v95_v48 = vmul.f32 %v2148_v10, %v80_v47 }
0x12db   :  { %v109_v49 = vadd.f32 %v2153_v11, %v95_v48 }
0x12dd   :  { %117 = vst [vmem:[#allocation2 + $0xe] sm:$0x3] %v109_v49 }
0x12e4   :  { %v1388_v52 = vld [vmem:[#allocation2 + $0xe] sm:$0x3] }
0x133c   :  { %v1306_v50 = vpop.permute.xlu0 %1305 }
0x133d   :  { %1844 = vmatmul.mubr.msk.f32.vlgmr.msra.gmra.mrb[12].mxu1 %vm119_vm1, %v1306_v50  ;;  %1855 = vmatmul.mubr.msk.f32.vlgmr.msra.gmra.mrb[14].mxu0 %vm119_vm1, %v1306_v50 }
0x133e   :  { %1960 = vmatpush3.bf16.msra.mxu1 %v2171_v32  ;;  %1865 = vmatprep.mubr.msk.f32.mxu1 %vm2069_vm0, %v2070_v4 }
0x133f   :  { %1961 = vmatprep.subr.bf16.mxu1 %v2068_v0 }
0x1342   :  { %1963 = vmatpush3.bf16.msra.mxu1 %v2177_v34 }
0x1410   :  { %v1375_v51 = vpop.f32.mrb[12].mxu1  ;;  %v1455_v10 = vpop.f32.mrb[14].mxu0 }
0x1411   :  { %v1376_v11 = vadd.f32 %v2206_v43, %v1375_v51  ;;  %v1459_v53 = vadd.f32 %v1455_v10, %v1388_v52  ;;  %v1845_v54 = vpop.f32.mrb[13].mxu1  ;;  %v1856_v55 = vpop.f32.mrb[15].mxu0 }
0x1413   :  { %v1605_v56 = vmul.f32 -1.442695, %v1376_v11  ;;  %2052 = vtanh.f32 %v1459_v53  ;;  %v1608_v34 = vmul.f32 -1.442695, %v1459_v53 }
0x1415   :  { %2054 = vpow2.f32 %v1605_v56 }
0x141d   :  { %v2053_v57 = vpop.eup %2052 }
0x141e   :  { %1469 = vrot.lane.b32.xlu0 %v2053_v57, %s2072_s10 }
0x141f   :  { %v2055_v32 = vpop.eup %2054 }
0x1420   :  { %v1382_v4 = vadd.f32 1.0, %v2055_v32 }
0x1422   :  { %2056 = vrcp.f32 %v1382_v4 }
0x1423   :  { %2058 = vpow2.f32 %v1608_v34 }
0x142c   :  { %v2057_v0 = vpop.eup %2056 }
0x142d   :  { %1606 = vst.msk [vmem:[%s2390_s6 + $0xc] sm:$0x3] %vm305_vm2, %v2057_v0  ;;  %v2059_v58 = vpop.eup %2058 }
0x142e   :  { %v1463_v59 = vadd.f32 1.0, %v2059_v58 }
0x1430   :  { %2060 = vrcp.f32 %v1463_v59 }
0x143a   :  { %v2061_v60 = vpop.eup %2060 }
0x143b   :  { %v1467_v63 = vmul.f32 %v2061_v60, %v1297_v41 }
0x1490   :  { %v1470_v61 = vpop.permute.xlu0 %1469 }
0x1491   :  { %v1472_v62 = vmul.f32 %v2061_v60, %v1470_v61 }
0x1493   :  { %1474 = vrot.lane.b32.xlu1 %v1472_v62, %s2073_s1 }
0x1505   :  { %v1475_v1 = vpop.permute.xlu1 %1474 }
0x1506   :  { %v1477_v2 = vadd.f32 %v1475_v1, %v1467_v63 }
0x1508   :  { %2062 = vtanh.f32 %v1477_v2 }
0x1512   :  { %v2063_v3 = vpop.eup %2062 }
0x1513   :  { %1480 = vrot.lane.b32.xlu0 %v2063_v3, %s2072_s10 }
0x1585   :  { %v1481_v6 = vpop.permute.xlu0 %1480 }
0x1586   :  { %v1483_v7 = vmul.f32 %v2061_v60, %v1481_v6 }
0x1588   :  { %1485 = vrot.lane.b32.xlu1 %v1483_v7, %s2073_s1 }
0x15fa   :  { %v1486_v8 = vpop.permute.xlu1 %1485 }
0x15fb   :  { %1866 = vmatmul.mubr.msk.f32.vlgmr.msra.gmra.mrb[14].mxu1 %vm119_vm1, %v1486_v8 }
0x16ce   :  { %v1555_v12 = vpop.f32.mrb[14].mxu1 }
0x16cf   :  { %v1556_v13 = vadd.f32 %v2206_v43, %v1555_v12  ;;  %v1867_v14 = vpop.f32.mrb[15].mxu1 }
0x16d1   :  { %v1610_v15 = vmul.f32 -1.442695, %v1556_v13 }
0x16d3   :  { %2064 = vpow2.f32 %v1610_v15 }
0x16dd   :  { %v2065_v16 = vpop.eup %2064 }
0x16de   :  { %v1562_v17 = vadd.f32 1.0, %v2065_v16 }
0x16e0   :  { %2066 = vrcp.f32 %v1562_v17 }
0x16ea   :  { %v2067_v18 = vpop.eup %2066 }
0x16eb   :  { %1611 = vst.msk [vmem:[%s2390_s6 + $0xe] sm:$0x3] %vm305_vm2, %v2067_v18 }

</bundles_post_ra>
